<compile_context>
chip_gen: v6e
topology: v6e:2x2x1
jax: 0.10.0
libtpu: 0.0.40
codegen_flags: <defaults>
</compile_context>

<pallas_src>
import math

import jax
import jax.numpy as jnp
from jax.experimental import pallas as pl
from jax.experimental.pallas import tpu as pltpu


def _ffn_kernel(x_ref, w1_ref, w3_ref, w2_ref, o_ref, acc_ref):
    # x_ref  : (TM, D)   token tile (input dtype)
    # w1_ref : (D, TH)   gate-proj slice (pre-transposed)
    # w3_ref : (D, TH)   up-proj slice   (pre-transposed)
    # w2_ref : (TH, D)   down-proj slice (pre-transposed)
    # o_ref  : (TM, D)   output tile (written on the last hidden-tile step)
    # acc_ref: (TM, D)   f32 accumulator, resident across the hidden (reduction) axis
    h_step = pl.program_id(1)

    @pl.when(h_step == 0)
    def _():
        acc_ref[...] = jnp.zeros_like(acc_ref)

    x = x_ref[...]
    # MXU matmuls in the input dtype, f32 accumulate.
    h1 = jnp.dot(x, w1_ref[...], preferred_element_type=jnp.float32)
    h3 = jnp.dot(x, w3_ref[...], preferred_element_type=jnp.float32)
    # silu(h1) * h3 in f32; exp/reciprocal go to the EUP slot.
    gated = h1 * (1.0 / (1.0 + jnp.exp(-h1))) * h3
    acc_ref[...] += jnp.dot(
        gated.astype(x.dtype), w2_ref[...], preferred_element_type=jnp.float32
    )

    @pl.when(h_step == pl.num_programs(1) - 1)
    def _():
        # TODO(synk): training-mode dropout (nn.Dropout) is not implemented;
        # this is the inference path where dropout == identity.
        o_ref[...] = acc_ref[...].astype(o_ref.dtype)


def _round_up(x, m):
    return (x + m - 1) // m * m


def init_feed_forward_params(w1, w2, w3):
    """One-time layout prep: transpose the PyTorch (out_features, in_features)
    Linear weights so the kernel contracts on a lane-dense axis without a
    per-call transpose.  Returns (w1_t (D,H), w2_t (H,D), w3_t (D,H))."""
    return w1.T, w2.T, w3.T


def feed_forward(x, w1_t, w2_t, w3_t, *, tile_m=256, tile_h=512):
    """FeedForward.forward (inference): w2(silu(w1(x)) * w3(x))."""
    orig_shape = x.shape
    d = orig_shape[-1]
    h = w1_t.shape[1]
    assert w1_t.shape == (d, h) and w3_t.shape == (d, h) and w2_t.shape == (h, d)

    xf = x.reshape(-1, d)
    n = xf.shape[0]

    # Token tile: multiple of 8 sublanes, capped so VMEM stays bounded and the
    # grid is long enough to pipeline DMAs / use both TensorCores on v7x.
    n8 = _round_up(max(n, 1), 8)
    tm = min(tile_m, n8)
    n_pad = _round_up(n, tm)
    if n_pad != n:
        xf = jnp.pad(xf, ((0, n_pad - n), (0, 0)))

    # Hidden tile: trailing reduction axis; keeps the three weight slices small
    # enough to double-buffer in VMEM on any TPU generation.
    if h <= tile_h:
        th = h
    else:
        th = next((c for c in (tile_h, 512, 256, 128) if h % c == 0), h)

    grid = (n_pad // tm, h // th)

    out = pl.pallas_call(
        _ffn_kernel,
        out_shape=jax.ShapeDtypeStruct((n_pad, d), x.dtype),
        grid_spec=pltpu.PrefetchScalarGridSpec(
            num_scalar_prefetch=0,
            grid=grid,
            in_specs=[
                pl.BlockSpec((tm, d), lambda i, j: (i, 0)),   # x tile
                pl.BlockSpec((d, th), lambda i, j: (0, j)),   # w1_t slice
                pl.BlockSpec((d, th), lambda i, j: (0, j)),   # w3_t slice
                pl.BlockSpec((th, d), lambda i, j: (j, 0)),   # w2_t slice
            ],
            out_specs=pl.BlockSpec((tm, d), lambda i, j: (i, 0)),
            scratch_shapes=[pltpu.VMEM((tm, d), jnp.float32)],
        ),
        compiler_params=pltpu.CompilerParams(
            dimension_semantics=("parallel", "arbitrary"),
        ),
    )(xf, w1_t, w3_t, w2_t)

    if n_pad != n:
        out = out[:n]
    return out.reshape(orig_shape)


def _reference(x, w1, w2, w3):
    """Pure-JAX reference of FeedForward.forward (PyTorch weight layout)."""
    xf = x.astype(jnp.float32)
    h1 = xf @ w1.T.astype(jnp.float32)
    h3 = xf @ w3.T.astype(jnp.float32)
    gated = h1 * jax.nn.sigmoid(h1) * h3
    return (gated @ w2.T.astype(jnp.float32)).astype(x.dtype)


if __name__ == "__main__":
    # LMConfig-like small settings.
    batch, seq, dim = 2, 8, 32
    multiple_of = 64
    hidden_dim = 4 * dim
    hidden_dim = int(2 * hidden_dim / 3)
    hidden_dim = multiple_of * ((hidden_dim + multiple_of - 1) // multiple_of)  # 128

    key = jax.random.PRNGKey(0)
    k_x, k_w1, k_w2, k_w3 = jax.random.split(key, 4)
    x = jax.random.normal(k_x, (batch, seq, dim), jnp.float32)

    # nn.Linear weights in PyTorch layout (out_features, in_features),
    # kaiming-uniform-like bounds (1/sqrt(fan_in)).
    b_in = 1.0 / math.sqrt(dim)
    b_hid = 1.0 / math.sqrt(hidden_dim)
    w1 = jax.random.uniform(k_w1, (hidden_dim, dim), jnp.float32, -b_in, b_in)
    w3 = jax.random.uniform(k_w3, (hidden_dim, dim), jnp.float32, -b_in, b_in)
    w2 = jax.random.uniform(k_w2, (dim, hidden_dim), jnp.float32, -b_hid, b_hid)

    # Pre-transpose the weights ONCE (not on every forward call).
    w1_t, w2_t, w3_t = init_feed_forward_params(w1, w2, w3)

    out = feed_forward(x, w1_t, w2_t, w3_t)
    jax.block_until_ready(out)

    ref = _reference(x, w1, w2, w3)
    assert out.shape == x.shape
    assert jnp.allclose(out, ref, atol=1e-2, rtol=1e-2), (
        "FFN output mismatch; max abs diff = "
        f"{float(jnp.max(jnp.abs(out - ref)))}"
    )

    print("KERNEL_OK")
</pallas_src>

<mosaic_0001>
module attributes {stable_mosaic.version = 11 : i64} {
  func.func @_ffn_kernel(%arg0: i32, %arg1: i32, %arg2: memref<16x32xf32, #tpu.memory_space<vmem>>, %arg3: memref<32x128xf32, #tpu.memory_space<vmem>>, %arg4: memref<32x128xf32, #tpu.memory_space<vmem>>, %arg5: memref<128x32xf32, #tpu.memory_space<vmem>>, %arg6: memref<16x32xf32, #tpu.memory_space<vmem>>, %arg7: memref<16x32xf32, #tpu.memory_space<vmem>>) attributes {dimension_semantics = [#tpu.dimension_semantics<parallel>, #tpu.dimension_semantics<arbitrary>], iteration_bounds = array<i64: 1, 1>, scalar_prefetch = 0 : i64, scratch_operands = 1 : i64, tpu.core_type = #tpu.core_type<tc>, window_params = [{transform_indices = @transform_0, window_bounds = array<i64: 16, 32>}, {transform_indices = @transform_1, window_bounds = array<i64: 32, 128>}, {transform_indices = @transform_2, window_bounds = array<i64: 32, 128>}, {transform_indices = @transform_3, window_bounds = array<i64: 128, 32>}, {transform_indices = @transform_4, window_bounds = array<i64: 16, 32>}]} {
    %c0_i32 = arith.constant 0 : i32
    %0 = arith.cmpi eq, %arg1, %c0_i32 : i32
    %1 = arith.extui %0 : i1 to i32
    %c0_i32_0 = arith.constant 0 : i32
    %2 = arith.cmpi ne, %1, %c0_i32_0 : i32
    scf.if %2 {
      %cst_19 = arith.constant 0.000000e+00 : f32
      %25 = vector.broadcast %cst_19 : f32 to vector<16x32xf32>
      %c0_20 = arith.constant 0 : index
      %c0_21 = arith.constant 0 : index
      %26 = vector.load %arg7[%c0_20, %c0_21] : memref<16x32xf32, #tpu.memory_space<vmem>>, vector<16x32xf32>
      tpu.vector_store %arg7[%c0_20, %c0_21], %25 {strides = array<i32>} : memref<16x32xf32, #tpu.memory_space<vmem>>, vector<16x32xf32>,
    } else {
    }
    %c0 = arith.constant 0 : index
    %c0_1 = arith.constant 0 : index
    %3 = vector.load %arg2[%c0, %c0_1] : memref<16x32xf32, #tpu.memory_space<vmem>>, vector<16x32xf32>
    %c0_2 = arith.constant 0 : index
    %c0_3 = arith.constant 0 : index
    %4 = vector.load %arg3[%c0_2, %c0_3] : memref<32x128xf32, #tpu.memory_space<vmem>>, vector<32x128xf32>
    %cst = arith.constant dense<0.000000e+00> : vector<16x128xf32>
    %5 = tpu.matmul %3, %4, %cst {dimension_numbers = #tpu.dot_dimension_numbers<[1], [0], [0], [1], [0, 0, 1, 1], [], []>} : vector<16x32xf32>, vector<32x128xf32>, vector<16x128xf32> -> vector<16x128xf32>
    %c0_4 = arith.constant 0 : index
    %c0_5 = arith.constant 0 : index
    %6 = vector.load %arg4[%c0_4, %c0_5] : memref<32x128xf32, #tpu.memory_space<vmem>>, vector<32x128xf32>
    %cst_6 = arith.constant dense<0.000000e+00> : vector<16x128xf32>
    %7 = tpu.matmul %3, %6, %cst_6 {dimension_numbers = #tpu.dot_dimension_numbers<[1], [0], [0], [1], [0, 0, 1, 1], [], []>} : vector<16x32xf32>, vector<32x128xf32>, vector<16x128xf32> -> vector<16x128xf32>
    %cst_7 = arith.constant 0.000000e+00 : f32
    %8 = vector.broadcast %cst_7 : f32 to vector<16x128xf32>
    %9 = arith.subf %8, %5 : vector<16x128xf32>
    %10 = math.exp %9 : vector<16x128xf32>
    %cst_8 = arith.constant 1.000000e+00 : f32
    %11 = vector.broadcast %cst_8 : f32 to vector<16x128xf32>
    %12 = arith.addf %11, %10 : vector<16x128xf32>
    %cst_9 = arith.constant 1.000000e+00 : f32
    %13 = vector.broadcast %cst_9 : f32 to vector<16x128xf32>
    %14 = arith.divf %13, %12 : vector<16x128xf32>
    %15 = arith.mulf %5, %14 : vector<16x128xf32>
    %16 = arith.mulf %15, %7 : vector<16x128xf32>
    %c0_10 = arith.constant 0 : index
    %c0_11 = arith.constant 0 : index
    %17 = vector.load %arg7[%c0_10, %c0_11] : memref<16x32xf32, #tpu.memory_space<vmem>>, vector<16x32xf32>
    %c0_12 = arith.constant 0 : index
    %c0_13 = arith.constant 0 : index
    %18 = vector.load %arg5[%c0_12, %c0_13] : memref<128x32xf32, #tpu.memory_space<vmem>>, vector<128x32xf32>
    %cst_14 = arith.constant dense<0.000000e+00> : vector<16x32xf32>
    %19 = tpu.matmul %16, %18, %cst_14 {dimension_numbers = #tpu.dot_dimension_numbers<[1], [0], [0], [1], [0, 0, 1, 1], [], []>} : vector<16x128xf32>, vector<128x32xf32>, vector<16x32xf32> -> vector<16x32xf32>
    %20 = arith.addf %17, %19 : vector<16x32xf32>
    %c0_15 = arith.constant 0 : index
    %c0_16 = arith.constant 0 : index
    %21 = vector.load %arg7[%c0_15, %c0_16] : memref<16x32xf32, #tpu.memory_space<vmem>>, vector<16x32xf32>
    tpu.vector_store %arg7[%c0_15, %c0_16], %20 {strides = array<i32>} : memref<16x32xf32, #tpu.memory_space<vmem>>, vector<16x32xf32>,
    %c0_i32_17 = arith.constant 0 : i32
    %22 = arith.cmpi eq, %arg1, %c0_i32_17 : i32
    %23 = arith.extui %22 : i1 to i32
    %c0_i32_18 = arith.constant 0 : i32
    %24 = arith.cmpi ne, %23, %c0_i32_18 : i32
    scf.if %24 {
      %c0_19 = arith.constant 0 : index
      %c0_20 = arith.constant 0 : index
      %25 = vector.load %arg7[%c0_19, %c0_20] : memref<16x32xf32, #tpu.memory_space<vmem>>, vector<16x32xf32>
      %c0_21 = arith.constant 0 : index
      %c0_22 = arith.constant 0 : index
      %26 = vector.load %arg6[%c0_21, %c0_22] : memref<16x32xf32, #tpu.memory_space<vmem>>, vector<16x32xf32>
      tpu.vector_store %arg6[%c0_21, %c0_22], %25 {strides = array<i32>} : memref<16x32xf32, #tpu.memory_space<vmem>>, vector<16x32xf32>,
    } else {
    }
    return
  }
  func.func @transform_0(%arg0: i32, %arg1: i32) -> (i32, i32) {
    %c0_i32 = arith.constant 0 : i32
    %c0_i32_0 = arith.constant 0 : i32
    return %arg0, %c0_i32 : i32, i32
  }
  func.func @transform_1(%arg0: i32, %arg1: i32) -> (i32, i32) {
    %c0_i32 = arith.constant 0 : i32
    %c0_i32_0 = arith.constant 0 : i32
    return %c0_i32, %arg1 : i32, i32
  }
  func.func @transform_2(%arg0: i32, %arg1: i32) -> (i32, i32) {
    %c0_i32 = arith.constant 0 : i32
    %c0_i32_0 = arith.constant 0 : i32
    return %c0_i32, %arg1 : i32, i32
  }
  func.func @transform_3(%arg0: i32, %arg1: i32) -> (i32, i32) {
    %c0_i32 = arith.constant 0 : i32
    %c0_i32_0 = arith.constant 0 : i32
    return %arg1, %c0_i32 : i32, i32
  }
  func.func @transform_4(%arg0: i32, %arg1: i32) -> (i32, i32) {
    %c0_i32 = arith.constant 0 : i32
    %c0_i32_0 = arith.constant 0 : i32
    return %arg0, %c0_i32 : i32, i32
  }
}

</mosaic_0001>

<bundles_post_ra>
// kernel: tpu_custom_call.1
= control target key start
LH: loop header
LB: loop body
LE: loop exit
PB: predicated region body
PF: predicated region fallthrough
CT: control target
= control target key end

     0   :  { %vm22_vm0 = vcmask 261120   ;;  %s573_s0 = inlined_call_operand.vmem [shape: f32[16,32], index: 0, kind: input, shape index: {}]   ;;  %s574_s1 = inlined_call_operand.vmem [shape: f32[32,128], index: 1, kind: input, shape index: {}]   ;;  %s575_s2 = inlined_call_operand.vmem [shape: f32[32,128], index: 2, kind: input, shape index: {}]   ;;  %s576_s3 = inlined_call_operand.vmem [shape: f32[128,32], index: 3, kind: input, shape index: {}]   ;;  %s577_s4 = inlined_call_operand.hbm [shape: f32[16,32], index: 4, kind: output, shape index: {}]  }
   0x1   :  { %v30_v0 = vld [vmem:[%s574_s1 + $0x18] sm:$0xff]  ;;  %v29_v1 = vld [vmem:[%s574_s1 + $0x10] sm:$0xff]  ;;  %v25_v2 = vld [vmem:[%s573_s0] sm:$0xff] }
   0x2   :  { %362 = vmatprep.subr.mxu1 %v30_v0  ;;  %v28_v3 = vld [vmem:[%s574_s1 + $0x8] sm:$0xff]  ;;  %370 = vmatprep.mubr.msk.f32.mxu1 %vm22_vm0, %v25_v2 }
   0x3   :  { %363 = vmatpush3.msra.mxu1 %v30_v0 }
   0x4   :  { %364 = vmatprep.subr.mxu1 %v29_v1 }
   0x5   :  { %9 = vsyncpa [#allocation4], 0  ;;  %365 = vmatpush3.msra.mxu1 %v29_v1  ;;  %v27_v4 = vld [vmem:[%s574_s1] sm:$0xff]  ;;  %v26_v5 = vld [vmem:[%s573_s0 + $0x8] sm:$0xff]  ;;  %v453_v26 = vmov 0.0  }
   0x6   :  { %366 = vmatprep.subr.mxu1 %v28_v3  ;;  %v116_v6 = vld [vmem:[%s575_s2 + $0x18] sm:$0xff]  ;;  %v115_v7 = vld [vmem:[%s575_s2 + $0x10] sm:$0xff]  ;;  %v114_v8 = vld [vmem:[%s575_s2 + $0x8] sm:$0xff]  ;;  %24 = vst.msk [vmem:[#allocation2 + $0x8] sm:$0xff] %vm22_vm0, %v453_v26 }
   0x7   :  { %367 = vmatpush3.msra.mxu1 %v28_v3  ;;  %v113_v9 = vld [vmem:[%s575_s2] sm:$0xff]  ;;  %v225_v10 = vld [vmem:[%s576_s3 + $0x78] sm:$0xff]  ;;  %v224_v11 = vld [vmem:[%s576_s3 + $0x70] sm:$0xff]  ;;  %23 = vst.msk [vmem:[#allocation2] sm:$0xff] %vm22_vm0, %v453_v26 }
   0x8   :  { %368 = vmatprep.subr.mxu1 %v27_v4  ;;  %384 = vmatprep.subr.mxu0 %v225_v10  ;;  %v223_v12 = vld [vmem:[%s576_s3 + $0x68] sm:$0xff]  ;;  %v222_v13 = vld [vmem:[%s576_s3 + $0x60] sm:$0xff]  ;;  %v221_v14 = vld [vmem:[%s576_s3 + $0x58] sm:$0xff] }
   0x9   :  { %369 = vmatpush3.msra.mxu1 %v27_v4  ;;  %385 = vmatpush3.msra.mxu0 %v225_v10  ;;  %v220_v15 = vld [vmem:[%s576_s3 + $0x50] sm:$0xff]  ;;  %v219_v16 = vld [vmem:[%s576_s3 + $0x48] sm:$0xff]  ;;  %v218_v17 = vld [vmem:[%s576_s3 + $0x40] sm:$0xff] }
   0xa   :  { %371 = vmatmul.mubr.msk.f32.vlgmr.msra.gmra.mxu1 %vm22_vm0, %v26_v5  ;;  %373 = vmatprep.subr.mxu1 %v116_v6  ;;  %v217_v18 = vld [vmem:[%s576_s3 + $0x38] sm:$0xff]  ;;  %v216_v19 = vld [vmem:[%s576_s3 + $0x30] sm:$0xff]  ;;  %v215_v20 = vld [vmem:[%s576_s3 + $0x28] sm:$0xff] }
   0xb   :  { %374 = vmatpush3.msra.mxu1 %v116_v6  ;;  %381 = vmatprep.mubr.msk.f32.mxu1 %vm22_vm0, %v25_v2  ;;  %v214_v21 = vld [vmem:[%s576_s3 + $0x20] sm:$0xff]  ;;  %v213_v22 = vld [vmem:[%s576_s3 + $0x18] sm:$0xff]  ;;  %v212_v23 = vld [vmem:[%s576_s3 + $0x10] sm:$0xff] }
   0xc   :  { %375 = vmatprep.subr.mxu1 %v115_v7  ;;  %386 = vmatprep.subr.mxu0 %v224_v11  ;;  %v211_v24 = vld [vmem:[%s576_s3 + $0x8] sm:$0xff]  ;;  %v210_v25 = vld [vmem:[%s576_s3] sm:$0xff]  ;;  %s454_s3 = smov [#allocation3]  }
   0xd   :  { %376 = vmatpush3.msra.mxu1 %v115_v7  ;;  %387 = vmatpush3.msra.mxu0 %v224_v11  ;;  %v209_v45 = vld [vmem:[#allocation2 + $0x8] sm:$0xff]  ;;  %s317_s10 = sshll.u32 %s454_s3, 4  ;;  %s318_s10 = int_to_ptr.vmem [resolvable:$true] %s317_s10 }
   0xe   :  { %377 = vmatprep.subr.mxu1 %v114_v8  ;;  %388 = vmatprep.subr.mxu0 %v223_v12  ;;  %v208_v47 = vld [vmem:[#allocation2] sm:$0xff]  ;;  %s431_s11 = scalar_lea.vmem %s318_s10, 256  ;;  %p436_p1 = scmp.lt.s32.totalorder %s318_s10, %s318_s10 }
   0xf   :  { %378 = vmatpush3.msra.mxu1 %v114_v8  ;;  %389 = vmatpush3.msra.mxu0 %v223_v12  ;;  %p432_p0 = scmp.ne.s32.totalorder %s318_s10, %s431_s11  ;;  %p437_p2 = scmp.lt.s32.totalorder %s431_s11, %s431_s11 }
  0x10   :  { %379 = vmatprep.subr.mxu1 %v113_v9  ;;  %390 = vmatprep.subr.mxu0 %v222_v13 }
  0x11   :  { %380 = vmatpush3.msra.mxu1 %v113_v9  ;;  %391 = vmatpush3.msra.mxu0 %v222_v13  ;;  %p438_p3 = por %p437_p2, %p436_p1 }
  0x12   :  { %382 = vmatmul.mubr.msk.f32.vlgmr.msra.gmra.mxu1 %vm22_vm0, %v26_v5  ;;  %392 = vmatprep.subr.mxu0 %v221_v14 }
  0x13   :  { %393 = vmatpush3.msra.mxu0 %v221_v14  ;;  %p439_p4 = pnand %p438_p3, %p432_p0 }
  0x14   :  { %394 = vmatprep.subr.mxu0 %v220_v15 }
  0x15   :  { %395 = vmatpush3.msra.mxu0 %v220_v15 }
  0x16   :  { %396 = vmatprep.subr.mxu0 %v219_v16 }
  0x17   :  { %397 = vmatpush3.msra.mxu0 %v219_v16 }
  0x18   :  { %398 = vmatprep.subr.mxu0 %v218_v17 }
  0x19   :  { %399 = vmatpush3.msra.mxu0 %v218_v17 }
  0x1a   :  { %400 = vmatprep.subr.mxu0 %v217_v18 }
  0x1b   :  { %401 = vmatpush3.msra.mxu0 %v217_v18 }
  0x1c   :  { %402 = vmatprep.subr.mxu0 %v216_v19 }
  0x1d   :  { %403 = vmatpush3.msra.mxu0 %v216_v19 }
  0x1e   :  { %404 = vmatprep.subr.mxu0 %v215_v20 }
  0x1f   :  { %405 = vmatpush3.msra.mxu0 %v215_v20 }
  0x20   :  { %406 = vmatprep.subr.mxu0 %v214_v21 }
  0x21   :  { %407 = vmatpush3.msra.mxu0 %v214_v21 }
  0x22   :  { %408 = vmatprep.subr.mxu0 %v213_v22 }
  0x23   :  { %409 = vmatpush3.msra.mxu0 %v213_v22 }
  0x24   :  { %410 = vmatprep.subr.mxu0 %v212_v23 }
  0x25   :  { %411 = vmatpush3.msra.mxu0 %v212_v23 }
  0x26   :  { %412 = vmatprep.subr.mxu0 %v211_v24 }
  0x27   :  { %413 = vmatpush3.msra.mxu0 %v211_v24 }
  0x28   :  { %414 = vmatprep.subr.mxu0 %v210_v25 }
  0x29   :  { %415 = vmatpush3.msra.mxu0 %v210_v25 }
  0xca   :  { %v372_v27 = vpop.f32.mrf.mxu1 }
  0xcb   :  { %v193_v28 = vsub.f32 0.0, %v372_v27 }
  0xcc   :  { %v104_v29 = vpop.f32.mrf.mxu1 }
  0xcd   :  { %v196_v30 = vmul.f32 1.442695, %v193_v28  ;;  %v192_v31 = vsub.f32 0.0, %v104_v29 }
  0xcf   :  { %423 = vpow2.f32 %v196_v30  ;;  %v194_v32 = vmul.f32 1.442695, %v192_v31 }
  0xd1   :  { %425 = vpow2.f32 %v194_v32 }
  0xd2   :  { %v383_v38 = vpop.f32.mrf.mxu1 }
  0xd4   :  { %v183_v42 = vpop.f32.mrf.mxu1 }
  0xdc   :  { %v424_v33 = vpop.eup %423 }
  0xdd   :  { %v199_v34 = vadd.f32 1.0, %v424_v33 }
  0xde   :  { %v426_v35 = vpop.eup %425 }
  0xdf   :  { %427 = vrcp.f32 %v199_v34  ;;  %v198_v36 = vadd.f32 1.0, %v426_v35 }
  0xe1   :  { %429 = vrcp.f32 %v198_v36 }
  0xec   :  { %v428_v37 = vpop.eup %427 }
  0xed   :  { %v205_v40 = vmul.f32 %v428_v37, %v372_v27 }
  0xee   :  { %v430_v39 = vpop.eup %429 }
  0xef   :  { %v204_v41 = vmul.f32 %v430_v39, %v104_v29  ;;  %v207_v44 = vmul.f32 %v383_v38, %v205_v40 }
  0xf1   :  { %v206_v43 = vmul.f32 %v204_v41, %v183_v42 }
  0xf3   :  { %416 = vmatprep.mubr.f32.mxu0 %v206_v43 }
  0xf4   :  { %417 = vmatmul.mubr.f32.vlgmr.msra.gmra.mxu0 %v207_v44 }
 0x1b4   :  { %v418_v46 = vpop.f32.mrf.mxu0 }
 0x1b5   :  { %v302_v48 = vadd.f32 %v418_v46, %v209_v45 }
 0x1b6   :  { %v292_v49 = vpop.f32.mrf.mxu0 }
 0x1b7   :  { %304 = vst.msk [vmem:[#allocation2 + $0x8] sm:$0xff] %vm22_vm0, %v302_v48  ;;  %v301_v50 = vadd.f32 %v292_v49, %v208_v47 }
 0x1b9   :  { %303 = vst.msk [vmem:[#allocation2] sm:$0xff] %vm22_vm0, %v301_v50 }
 0x1be   :  { %v309_v51 = vld [vmem:[#allocation2 + $0x8] sm:$0xff] }
 0x1bf   :  { %311 = vst.msk [vmem:[#allocation3 + $0x8] sm:$0xff] %vm22_vm0, %v309_v51 }
 0x1c0   :  { %v308_v52 = vld [vmem:[#allocation2] sm:$0xff] }
 0x1c1   :  { %310 = vst.msk [vmem:[#allocation3] sm:$0xff] %vm22_vm0, %v308_v52 }
 0x1c2   :  { %442 = shalt.err (!%p439_p4)
}
 0x1c3   :  { %s455_s2 = smov 128   ;;  %s456_s12 = smov 8  }
 0x1c4   :  { %323 = dma.vmem_to_hbm [thread:$0]  %s318_s10, 256, %s577_s4, [#allocation4], %s455_s2, %s455_s2, %s456_s12  }
 0x1c5   :  { %451 = dma.done.wait [#allocation4], 256  }
 0x1c6   :  { %452 = vsyncadd [#allocation4], 4294967040 }
 0x1c7   :  { %327 = vsyncpa [#allocation4], 1 }

</bundles_post_ra>
